<compile_context>
chip_gen: v6e
topology: v6e:2x2x1
jax: 0.10.0
libtpu: 0.0.40
codegen_flags: <defaults>
</compile_context>

<pallas_src>
import jax
import jax.numpy as jnp
from jax.experimental import pallas as pl
from jax.experimental.pallas import tpu as pltpu

IN_FEATURES_EACH = 128
IN_FEATURES = IN_FEATURES_EACH * 3   # 384
OUT_FEATURES = 128

# Batch tile for the gridded path. 512 amortizes the ~0.35 us per-grid-step
# overhead (~85% of HBM roofline per measured Pallas data) and fits easily in
# scoped VMEM on every generation (v5e 16 MiB default included).
_TM = 512
_SMALL_BATCH_MAX = _TM


def _cross_agg_kernel(x1_ref, x2_ref, x3_ref, wt_ref, b_ref, o_ref):
    # x*_ref: (TM_or_B, 128)
    # wt_ref: (384, 128)  -- pre-transposed, in-features-major (K, N)
    # b_ref:  (1, 128)
    # o_ref:  (TM_or_B, 128)
    #
    # Static sublane slices of the weight Ref are zero-cost views; the MXU
    # streams them from VMEM without pulling 48 vregs of weight into registers.
    acc = jnp.dot(x1_ref[...], wt_ref[0:IN_FEATURES_EACH, :],
                  preferred_element_type=jnp.float32)
    acc = acc + jnp.dot(x2_ref[...],
                        wt_ref[IN_FEATURES_EACH:2 * IN_FEATURES_EACH, :],
                        preferred_element_type=jnp.float32)
    acc = acc + jnp.dot(x3_ref[...],
                        wt_ref[2 * IN_FEATURES_EACH:IN_FEATURES, :],
                        preferred_element_type=jnp.float32)
    o_ref[...] = (acc + b_ref[...]).astype(o_ref.dtype)


def _cross_agg_small(x1, x2, x3, wt, b2d):
    """Grid-less single invocation: everything lives in one VMEM block."""
    B = x1.shape[0]
    vmem = lambda: pl.BlockSpec(memory_space=pltpu.MemorySpace.VMEM)
    return pl.pallas_call(
        _cross_agg_kernel,
        out_shape=jax.ShapeDtypeStruct((B, OUT_FEATURES), x1.dtype),
        in_specs=[vmem(), vmem(), vmem(), vmem(), vmem()],
        out_specs=vmem(),
    )(x1, x2, x3, wt, b2d)


def _cross_agg_tiled(x1, x2, x3, wt, b2d):
    """Batch-tiled grid: (TM, 128) activation tiles, weight/bias held resident."""
    B = x1.shape[0]
    x_spec = lambda: pl.BlockSpec((_TM, IN_FEATURES_EACH), lambda i: (i, 0))
    return pl.pallas_call(
        _cross_agg_kernel,
        out_shape=jax.ShapeDtypeStruct((B, OUT_FEATURES), x1.dtype),
        grid_spec=pltpu.PrefetchScalarGridSpec(
            num_scalar_prefetch=0,
            grid=(pl.cdiv(B, _TM),),
            in_specs=[
                x_spec(), x_spec(), x_spec(),
                # Constant index_map -> loaded once, resident in VMEM.
                pl.BlockSpec((IN_FEATURES, OUT_FEATURES), lambda i: (0, 0)),
                pl.BlockSpec((1, OUT_FEATURES), lambda i: (0, 0)),
            ],
            out_specs=pl.BlockSpec((_TM, OUT_FEATURES), lambda i: (i, 0)),
        ),
        compiler_params=pltpu.CompilerParams(
            dimension_semantics=("parallel",)),  # megacore sharding on v7x
    )(x1, x2, x3, wt, b2d)


@jax.jit
def cross_aggregation_module(x1, x2, x3, weight, bias):
    """x1/x2/x3: (B, 128); weight: (128, 384) nn.Linear (out, in) layout; bias: (128,)."""
    B = x1.shape[0]
    # One tiny (128,384) transpose per call, amortized/folded by XLA -- keeps
    # the kernel contraction canonical (K, N) with no in-kernel XLU transposes.
    wt = weight.T  # (384, 128) in-features-major
    b2d = bias.reshape(1, OUT_FEATURES)
    if B <= _SMALL_BATCH_MAX:
        return _cross_agg_small(x1, x2, x3, wt, b2d)
    return _cross_agg_tiled(x1, x2, x3, wt, b2d)


if __name__ == "__main__":
    key = jax.random.PRNGKey(0)
    k1, k2, k3, kw, kb = jax.random.split(key, 5)

    # Deterministic parameter init (mimics nn.Linear's uniform(-1/sqrt(in), ...))
    bound = 1.0 / (IN_FEATURES ** 0.5)
    weight = jax.random.uniform(kw, (OUT_FEATURES, IN_FEATURES),
                                minval=-bound, maxval=bound, dtype=jnp.float32)
    bias = jax.random.uniform(kb, (OUT_FEATURES,),
                              minval=-bound, maxval=bound, dtype=jnp.float32)

    def ref_fn(a, b, c):
        return jnp.concatenate([a, b, c], axis=1) @ weight.T + bias

    # --- small batch: grid-less path ---
    B = 8
    x1 = jax.random.normal(k1, (B, IN_FEATURES_EACH), dtype=jnp.float32)
    x2 = jax.random.normal(k2, (B, IN_FEATURES_EACH), dtype=jnp.float32)
    x3 = jax.random.normal(k3, (B, IN_FEATURES_EACH), dtype=jnp.float32)
    out = jax.block_until_ready(cross_aggregation_module(x1, x2, x3, weight, bias))
    assert out.shape == (B, OUT_FEATURES)
    assert jnp.allclose(out, ref_fn(x1, x2, x3), atol=1e-4, rtol=1e-4)

    # --- larger batch: batch-tiled (parallel) path, non-multiple of _TM ---
    B2 = 640
    y1 = jax.random.normal(k1, (B2, IN_FEATURES_EACH), dtype=jnp.float32)
    y2 = jax.random.normal(k2, (B2, IN_FEATURES_EACH), dtype=jnp.float32)
    y3 = jax.random.normal(k3, (B2, IN_FEATURES_EACH), dtype=jnp.float32)
    out2 = jax.block_until_ready(cross_aggregation_module(y1, y2, y3, weight, bias))
    assert out2.shape == (B2, OUT_FEATURES)
    assert jnp.allclose(out2, ref_fn(y1, y2, y3), atol=1e-4, rtol=1e-4)

    print("KERNEL_OK")
</pallas_src>

<mosaic_0001>
module attributes {stable_mosaic.version = 11 : i64} {
  func.func @_cross_agg_kernel(%arg0: memref<8x128xf32, #tpu.memory_space<vmem>>, %arg1: memref<8x128xf32, #tpu.memory_space<vmem>>, %arg2: memref<8x128xf32, #tpu.memory_space<vmem>>, %arg3: memref<384x128xf32, #tpu.memory_space<vmem>>, %arg4: memref<1x128xf32, #tpu.memory_space<vmem>>, %arg5: memref<8x128xf32, #tpu.memory_space<vmem>>) attributes {dimension_semantics = [], scalar_prefetch = 0 : i64, scratch_operands = 0 : i64, tpu.core_type = #tpu.core_type<tc>} {
    %c0 = arith.constant 0 : index
    %c0_0 = arith.constant 0 : index
    %0 = vector.load %arg0[%c0, %c0_0] : memref<8x128xf32, #tpu.memory_space<vmem>>, vector<8x128xf32>
    %c0_1 = arith.constant 0 : index
    %c0_2 = arith.constant 0 : index
    %1 = vector.load %arg3[%c0_1, %c0_2] : memref<384x128xf32, #tpu.memory_space<vmem>>, vector<128x128xf32>
    %cst = arith.constant dense<0.000000e+00> : vector<8x128xf32>
    %2 = tpu.matmul %0, %1, %cst {dimension_numbers = #tpu.dot_dimension_numbers<[1], [0], [0], [1], [0, 0, 1, 1], [], []>} : vector<8x128xf32>, vector<128x128xf32>, vector<8x128xf32> -> vector<8x128xf32>
    %c0_3 = arith.constant 0 : index
    %c0_4 = arith.constant 0 : index
    %3 = vector.load %arg1[%c0_3, %c0_4] : memref<8x128xf32, #tpu.memory_space<vmem>>, vector<8x128xf32>
    %c128 = arith.constant 128 : index
    %c0_5 = arith.constant 0 : index
    %4 = vector.load %arg3[%c128, %c0_5] : memref<384x128xf32, #tpu.memory_space<vmem>>, vector<128x128xf32>
    %cst_6 = arith.constant dense<0.000000e+00> : vector<8x128xf32>
    %5 = tpu.matmul %3, %4, %cst_6 {dimension_numbers = #tpu.dot_dimension_numbers<[1], [0], [0], [1], [0, 0, 1, 1], [], []>} : vector<8x128xf32>, vector<128x128xf32>, vector<8x128xf32> -> vector<8x128xf32>
    %6 = arith.addf %2, %5 : vector<8x128xf32>
    %c0_7 = arith.constant 0 : index
    %c0_8 = arith.constant 0 : index
    %7 = vector.load %arg2[%c0_7, %c0_8] : memref<8x128xf32, #tpu.memory_space<vmem>>, vector<8x128xf32>
    %c256 = arith.constant 256 : index
    %c0_9 = arith.constant 0 : index
    %8 = vector.load %arg3[%c256, %c0_9] : memref<384x128xf32, #tpu.memory_space<vmem>>, vector<128x128xf32>
    %cst_10 = arith.constant dense<0.000000e+00> : vector<8x128xf32>
    %9 = tpu.matmul %7, %8, %cst_10 {dimension_numbers = #tpu.dot_dimension_numbers<[1], [0], [0], [1], [0, 0, 1, 1], [], []>} : vector<8x128xf32>, vector<128x128xf32>, vector<8x128xf32> -> vector<8x128xf32>
    %10 = arith.addf %6, %9 : vector<8x128xf32>
    %c0_11 = arith.constant 0 : index
    %c0_12 = arith.constant 0 : index
    %11 = vector.load %arg4[%c0_11, %c0_12] : memref<1x128xf32, #tpu.memory_space<vmem>>, vector<1x128xf32>
    %12 = vector.broadcast %11 : vector<1x128xf32> to vector<8x128xf32>
    %13 = arith.addf %10, %12 : vector<8x128xf32>
    %c0_13 = arith.constant 0 : index
    %c0_14 = arith.constant 0 : index
    %14 = vector.load %arg5[%c0_13, %c0_14] : memref<8x128xf32, #tpu.memory_space<vmem>>, vector<8x128xf32>
    tpu.vector_store %arg5[%c0_13, %c0_14], %13 {strides = array<i32>} : memref<8x128xf32, #tpu.memory_space<vmem>>, vector<8x128xf32>,
    return
  }
}

</mosaic_0001>

<bundles_post_ra>
// kernel: cross_aggregation_module.1
= control target key start
LH: loop header
LB: loop body
LE: loop exit
PB: predicated region body
PF: predicated region fallthrough
CT: control target
= control target key end

     0   :  { %v488_v2 = vmov 0.0   ;;  %s731_s0 = inlined_call_operand.vmem [shape: f32[8,128], index: 0, kind: input, shape index: {}]   ;;  %s732_s1 = inlined_call_operand.vmem [shape: f32[8,128], index: 1, kind: input, shape index: {}]   ;;  %s733_s2 = inlined_call_operand.vmem [shape: f32[8,128], index: 2, kind: input, shape index: {}]   ;;  %s734_s3 = inlined_call_operand.vmem [shape: f32[384,128], index: 3, kind: input, shape index: {}]   ;;  %s735_s4 = inlined_call_operand.vmem [shape: f32[1,128], index: 4, kind: input, shape index: {}]   ;;  %s736_s5 = inlined_call_operand.hbm [shape: f32[8,128], index: 5, kind: output, shape index: {}]  }
   0x1   :  { %v54_v0 = vld [vmem:[%s734_s3 + $0xf8] sm:$0xff]  ;;  %358 = vmatprep.subr.mxu0 %v488_v2  ;;  %393 = vmatprep.subr.mxu1 %v488_v2  ;;  %v53_v3 = vld [vmem:[%s734_s3 + $0xf0] sm:$0xff]  ;;  %v52_v5 = vld [vmem:[%s734_s3 + $0xe8] sm:$0xff] }
   0x2   :  { %v37_v1 = vld [vmem:[%s734_s3 + $0x78] sm:$0xff]  ;;  %v36_v4 = vld [vmem:[%s734_s3 + $0x70] sm:$0xff]  ;;  %359 = vmatpush3.msra.mxu0 %v54_v0  ;;  %v35_v6 = vld [vmem:[%s734_s3 + $0x68] sm:$0xff] }
   0x3   :  { %394 = vmatpush3.msra.mxu1 %v37_v1  ;;  %360 = vmatprep.subr.mxu0 %v488_v2  ;;  %v51_v7 = vld [vmem:[%s734_s3 + $0xe0] sm:$0xff]  ;;  %v50_v9 = vld [vmem:[%s734_s3 + $0xd8] sm:$0xff]  ;;  %v49_v11 = vld [vmem:[%s734_s3 + $0xd0] sm:$0xff] }
   0x4   :  { %395 = vmatprep.subr.mxu1 %v488_v2  ;;  %361 = vmatpush3.msra.mxu0 %v53_v3  ;;  %v34_v8 = vld [vmem:[%s734_s3 + $0x60] sm:$0xff]  ;;  %v33_v10 = vld [vmem:[%s734_s3 + $0x58] sm:$0xff]  ;;  %v32_v12 = vld [vmem:[%s734_s3 + $0x50] sm:$0xff] }
   0x5   :  { %396 = vmatpush3.msra.mxu1 %v36_v4  ;;  %362 = vmatprep.subr.mxu0 %v488_v2  ;;  %v48_v13 = vld [vmem:[%s734_s3 + $0xc8] sm:$0xff]  ;;  %v47_v15 = vld [vmem:[%s734_s3 + $0xc0] sm:$0xff]  ;;  %v46_v17 = vld [vmem:[%s734_s3 + $0xb8] sm:$0xff] }
   0x6   :  { %397 = vmatprep.subr.mxu1 %v488_v2  ;;  %363 = vmatpush3.msra.mxu0 %v52_v5  ;;  %v31_v14 = vld [vmem:[%s734_s3 + $0x48] sm:$0xff]  ;;  %v30_v16 = vld [vmem:[%s734_s3 + $0x40] sm:$0xff]  ;;  %v29_v18 = vld [vmem:[%s734_s3 + $0x38] sm:$0xff] }
   0x7   :  { %398 = vmatpush3.msra.mxu1 %v35_v6  ;;  %364 = vmatprep.subr.mxu0 %v488_v2  ;;  %v45_v19 = vld [vmem:[%s734_s3 + $0xb0] sm:$0xff] }
   0x8   :  { %399 = vmatprep.subr.mxu1 %v488_v2  ;;  %365 = vmatpush3.msra.mxu0 %v51_v7  ;;  %v28_v20 = vld [vmem:[%s734_s3 + $0x30] sm:$0xff] }
   0x9   :  { %400 = vmatpush3.msra.mxu1 %v34_v8  ;;  %366 = vmatprep.subr.mxu0 %v488_v2 }
   0xa   :  { %401 = vmatprep.subr.mxu1 %v488_v2  ;;  %367 = vmatpush3.msra.mxu0 %v50_v9 }
   0xb   :  { %402 = vmatpush3.msra.mxu1 %v33_v10  ;;  %368 = vmatprep.subr.mxu0 %v488_v2 }
   0xc   :  { %403 = vmatprep.subr.mxu1 %v488_v2  ;;  %369 = vmatpush3.msra.mxu0 %v49_v11 }
   0xd   :  { %404 = vmatpush3.msra.mxu1 %v32_v12  ;;  %370 = vmatprep.subr.mxu0 %v488_v2 }
   0xe   :  { %405 = vmatprep.subr.mxu1 %v488_v2  ;;  %371 = vmatpush3.msra.mxu0 %v48_v13 }
   0xf   :  { %406 = vmatpush3.msra.mxu1 %v31_v14  ;;  %372 = vmatprep.subr.mxu0 %v488_v2 }
  0x10   :  { %407 = vmatprep.subr.mxu1 %v488_v2  ;;  %373 = vmatpush3.msra.mxu0 %v47_v15 }
  0x11   :  { %408 = vmatpush3.msra.mxu1 %v30_v16  ;;  %374 = vmatprep.subr.mxu0 %v488_v2 }
  0x12   :  { %409 = vmatprep.subr.mxu1 %v488_v2 }
  0x13   :  { %10 = vsyncpa [#allocation3], 0  ;;  %375 = vmatpush3.msra.mxu0 %v46_v17  ;;  %410 = vmatpush3.msra.mxu1 %v29_v18  ;;  %v44_v21 = vld [vmem:[%s734_s3 + $0xa8] sm:$0xff]  ;;  %v43_v23 = vld [vmem:[%s734_s3 + $0xa0] sm:$0xff]  ;;  %vm489_vm0 = vmmov 0  }
  0x14   :  { %376 = vmatprep.subr.mxu0 %v488_v2  ;;  %411 = vmatprep.subr.mxu1 %v488_v2  ;;  %v27_v22 = vld [vmem:[%s734_s3 + $0x28] sm:$0xff]  ;;  %v26_v24 = vld [vmem:[%s734_s3 + $0x20] sm:$0xff]  ;;  %v42_v25 = vld [vmem:[%s734_s3 + $0x98] sm:$0xff] }
  0x15   :  { %377 = vmatpush3.msra.mxu0 %v45_v19  ;;  %412 = vmatpush3.msra.mxu1 %v28_v20  ;;  %v25_v26 = vld [vmem:[%s734_s3 + $0x18] sm:$0xff]  ;;  %v41_v27 = vld [vmem:[%s734_s3 + $0x90] sm:$0xff]  ;;  %v40_v29 = vld [vmem:[%s734_s3 + $0x88] sm:$0xff] }
  0x16   :  { %378 = vmatprep.subr.mxu0 %v488_v2  ;;  %413 = vmatprep.subr.mxu1 %v488_v2  ;;  %v24_v28 = vld [vmem:[%s734_s3 + $0x10] sm:$0xff]  ;;  %v23_v30 = vld [vmem:[%s734_s3 + $0x8] sm:$0xff]  ;;  %v39_v31 = vld [vmem:[%s734_s3 + $0x80] sm:$0xff] }
  0x17   :  { %379 = vmatpush3.msra.mxu0 %v44_v21  ;;  %414 = vmatpush3.msra.mxu1 %v27_v22  ;;  %v38_v32 = vld [vmem:[%s732_s1] sm:$0xff]  ;;  %v211_v35 = vld [vmem:[%s734_s3 + $0x178] sm:$0xff]  ;;  %v210_v36 = vld [vmem:[%s734_s3 + $0x170] sm:$0xff] }
  0x18   :  { %380 = vmatprep.subr.mxu0 %v488_v2  ;;  %415 = vmatprep.subr.mxu1 %v488_v2  ;;  %v22_v33 = vld [vmem:[%s734_s3] sm:$0xff]  ;;  %v209_v37 = vld [vmem:[%s734_s3 + $0x168] sm:$0xff]  ;;  %v207_v39 = vld [vmem:[%s734_s3 + $0x158] sm:$0xff] }
  0x19   :  { %381 = vmatpush3.msra.mxu0 %v43_v23  ;;  %416 = vmatpush3.msra.mxu1 %v26_v24  ;;  %v21_v34 = vld [vmem:[%s731_s0] sm:$0xff]  ;;  %v206_v40 = vld [vmem:[%s734_s3 + $0x150] sm:$0xff]  ;;  %v205_v41 = vld [vmem:[%s734_s3 + $0x148] sm:$0xff] }
  0x1a   :  { %382 = vmatprep.subr.mxu0 %v488_v2  ;;  %417 = vmatprep.subr.mxu1 %v488_v2  ;;  %v208_v38 = vld [vmem:[%s734_s3 + $0x160] sm:$0xff]  ;;  %v203_v43 = vld [vmem:[%s734_s3 + $0x138] sm:$0xff]  ;;  %v202_v44 = vld [vmem:[%s734_s3 + $0x130] sm:$0xff] }
  0x1b   :  { %383 = vmatpush3.msra.mxu0 %v42_v25  ;;  %418 = vmatpush3.msra.mxu1 %v25_v26  ;;  %v204_v42 = vld [vmem:[%s734_s3 + $0x140] sm:$0xff]  ;;  %v201_v45 = vld [vmem:[%s734_s3 + $0x128] sm:$0xff]  ;;  %v199_v47 = vld [vmem:[%s734_s3 + $0x118] sm:$0xff] }
  0x1c   :  { %384 = vmatprep.subr.mxu0 %v488_v2  ;;  %419 = vmatprep.subr.mxu1 %v488_v2  ;;  %v200_v46 = vld [vmem:[%s734_s3 + $0x120] sm:$0xff]  ;;  %v198_v48 = vld [vmem:[%s734_s3 + $0x110] sm:$0xff]  ;;  %v197_v49 = vld [vmem:[%s734_s3 + $0x108] sm:$0xff] }
  0x1d   :  { %385 = vmatpush3.msra.mxu0 %v41_v27  ;;  %420 = vmatpush3.msra.mxu1 %v24_v28  ;;  %v196_v50 = vld [vmem:[%s734_s3 + $0x100] sm:$0xff]  ;;  %s490_s3 = smov [#allocation2]  }
  0x1e   :  { %386 = vmatprep.subr.mxu0 %v488_v2  ;;  %421 = vmatprep.subr.mxu1 %v488_v2  ;;  %v195_v51 = vld [vmem:[%s733_s2] sm:$0xff]  ;;  %s298_s18 = sshll.u32 %s490_s3, 4  ;;  %s299_s18 = int_to_ptr.vmem [resolvable:$true] %s298_s18 }
  0x1f   :  { %387 = vmatpush3.msra.mxu0 %v40_v29  ;;  %422 = vmatpush3.msra.mxu1 %v23_v30  ;;  %v306_v58 = vld [vmem:[%s735_s4] ss:$0 sm:$0xff]  ;;  %s466_s2 = scalar_lea.vmem %s299_s18, 128  ;;  %p471_p1 = scmp.lt.s32.totalorder %s299_s18, %s299_s18 }
  0x20   :  { %388 = vmatprep.subr.mxu0 %v488_v2  ;;  %390 = vmatprep.mubr.msk.f32.mxu0 %vm489_vm0, %v488_v2  ;;  %p467_p0 = scmp.ne.s32.totalorder %s299_s18, %s466_s2  ;;  %p472_p2 = scmp.lt.s32.totalorder %s466_s2, %s466_s2 }
  0x21   :  { %389 = vmatpush3.msra.mxu0 %v39_v31  ;;  %423 = vmatprep.subr.mxu1 %v488_v2 }
  0x22   :  { %391 = vmatmul.mubr.f32.vlgmr.msra.gmra.mxu0 %v38_v32  ;;  %424 = vmatpush3.msra.mxu1 %v22_v33  ;;  %p473_p3 = por %p472_p2, %p471_p1 }
  0x23   :  { %425 = vmatprep.mubr.msk.f32.mxu1 %vm489_vm0, %v488_v2  ;;  %428 = vmatprep.subr.mxu0 %v488_v2 }
  0x24   :  { %426 = vmatmul.mubr.f32.vlgmr.msra.gmra.mxu1 %v21_v34  ;;  %429 = vmatpush3.msra.mxu0 %v211_v35  ;;  %p474_p4 = pnand %p473_p3, %p467_p0 }
  0x25   :  { %430 = vmatprep.subr.mxu0 %v488_v2  ;;  %460 = vmatprep.mubr.msk.f32.mxu0 %vm489_vm0, %v488_v2 }
  0x26   :  { %431 = vmatpush3.msra.mxu0 %v210_v36 }
  0x27   :  { %432 = vmatprep.subr.mxu0 %v488_v2 }
  0x28   :  { %433 = vmatpush3.msra.mxu0 %v209_v37 }
  0x29   :  { %434 = vmatprep.subr.mxu0 %v488_v2 }
  0x2a   :  { %435 = vmatpush3.msra.mxu0 %v208_v38 }
  0x2b   :  { %436 = vmatprep.subr.mxu0 %v488_v2 }
  0x2c   :  { %437 = vmatpush3.msra.mxu0 %v207_v39 }
  0x2d   :  { %438 = vmatprep.subr.mxu0 %v488_v2 }
  0x2e   :  { %439 = vmatpush3.msra.mxu0 %v206_v40 }
  0x2f   :  { %440 = vmatprep.subr.mxu0 %v488_v2 }
  0x30   :  { %441 = vmatpush3.msra.mxu0 %v205_v41 }
  0x31   :  { %442 = vmatprep.subr.mxu0 %v488_v2 }
  0x32   :  { %443 = vmatpush3.msra.mxu0 %v204_v42 }
  0x33   :  { %444 = vmatprep.subr.mxu0 %v488_v2 }
  0x34   :  { %445 = vmatpush3.msra.mxu0 %v203_v43 }
  0x35   :  { %446 = vmatprep.subr.mxu0 %v488_v2 }
  0x36   :  { %447 = vmatpush3.msra.mxu0 %v202_v44 }
  0x37   :  { %448 = vmatprep.subr.mxu0 %v488_v2 }
  0x38   :  { %449 = vmatpush3.msra.mxu0 %v201_v45 }
  0x39   :  { %450 = vmatprep.subr.mxu0 %v488_v2 }
  0x3a   :  { %451 = vmatpush3.msra.mxu0 %v200_v46 }
  0x3b   :  { %452 = vmatprep.subr.mxu0 %v488_v2 }
  0x3c   :  { %453 = vmatpush3.msra.mxu0 %v199_v47 }
  0x3d   :  { %454 = vmatprep.subr.mxu0 %v488_v2 }
  0x3e   :  { %455 = vmatpush3.msra.mxu0 %v198_v48 }
  0x3f   :  { %456 = vmatprep.subr.mxu0 %v488_v2 }
  0x40   :  { %457 = vmatpush3.msra.mxu0 %v197_v49 }
  0x41   :  { %458 = vmatprep.subr.mxu0 %v488_v2 }
  0x42   :  { %459 = vmatpush3.msra.mxu0 %v196_v50 }
  0x43   :  { %461 = vmatmul.mubr.f32.vlgmr.msra.gmra.mxu0 %v195_v51 }
  0xe2   :  { %v121_v52 = vpop.f32.mrf.mxu0 }
  0xe4   :  { %v191_v53 = vpop.f32.mrf.mxu1  ;;  %v392_v54 = vpop.f32.mrf.mxu0 }
  0xe5   :  { %v192_v56 = vadd.f32 %v191_v53, %v121_v52 }
  0xe6   :  { %v427_v55 = vpop.f32.mrf.mxu1 }
 0x103   :  { %v278_v57 = vpop.f32.mrf.mxu0 }
 0x104   :  { %v282_v59 = vadd.f32 %v278_v57, %v192_v56 }
 0x105   :  { %v462_v60 = vpop.f32.mrf.mxu0 }
 0x106   :  { %v290_v61 = vadd.f32 %v306_v58, %v282_v59 }
 0x108   :  { %291 = vst [vmem:[#allocation2] sm:$0xff] %v290_v61 }
 0x109   :  { %477 = shalt.err (!%p474_p4)
}
 0x10a   :  { %301 = dma.vmem_to_hbm [thread:$0]  %s299_s18, 128, %s736_s5, [#allocation3]  }
 0x10b   :  { %486 = dma.done.wait [#allocation3], 128  }
 0x10c   :  { %487 = vsyncadd [#allocation3], 4294967168 }
 0x10d   :  { %305 = vsyncpa [#allocation3], 1 }

</bundles_post_ra>
